<compile_context>
chip_gen: v7x
topology: tpu7x:2x2x1
jax: 0.10.0
libtpu: 0.0.40
codegen_flags: <defaults>
</compile_context>

<pallas_src>
import jax
import jax.numpy as jnp
from jax.experimental import pallas as pl
from jax.experimental.pallas import tpu as pltpu

K_IN = 784          # input features
N_HID = 64          # hidden features
N_OUT = 10          # output features
TB_MAX = 1024       # max batch tile (2 x 1024*784*4B ~ 6.3 MiB of VMEM for x)


def mlp_kernel(x_ref, w1_ref, b1_ref, w2_ref, b2_ref, o_ref):
    # First linear: f32 matmul on the MXU (accumulate in f32).
    h = jnp.dot(x_ref[...], w1_ref[...], preferred_element_type=jnp.float32)
    # Bias add + ReLU on the VPU.
    h = jnp.maximum(h + b1_ref[...], 0.0)
    # Second linear.
    out = jnp.dot(h, w2_ref[...], preferred_element_type=jnp.float32)
    o_ref[...] = (out + b2_ref[...]).astype(o_ref.dtype)


def mlp_forward(x, w1, b1, w2, b2):
    """x: (B, 784) f32; w1: (784, 64); b1: (1, 64); w2: (64, 10); b2: (1, 10).

    Weights are stored as (in_features, out_features), i.e. x @ W + b, which is
    equivalent to PyTorch's x @ W.T + b with W of shape (out, in).
    """
    B = x.shape[0]

    # Batch tile: if the whole batch fits in one tile, use the full batch dim
    # (always a legal block shape).  Otherwise tile at TB_MAX (multiple of 8);
    # the final partial block (if any) is handled by Pallas write-masking —
    # no wrapper-side batch padding / extra HBM copy of x.
    TB = B if B <= TB_MAX else TB_MAX
    grid = (pl.cdiv(B, TB),)

    cost = pl.CostEstimate(
        flops=2 * B * (K_IN * N_HID + N_HID * N_OUT),
        transcendentals=0,
        bytes_accessed=(x.size * 4 + w1.size * 4 + b1.size * 4
                        + w2.size * 4 + b2.size * 4 + B * N_OUT * 4),
    )

    out = pl.pallas_call(
        mlp_kernel,
        out_shape=jax.ShapeDtypeStruct((B, N_OUT), jnp.float32),
        grid=grid,
        in_specs=[
            pl.BlockSpec((TB, K_IN), lambda i: (i, 0)),      # x tile (pipelined)
            pl.BlockSpec((K_IN, N_HID), lambda i: (0, 0)),   # w1 resident
            pl.BlockSpec((1, N_HID), lambda i: (0, 0)),      # b1 resident
            pl.BlockSpec((N_HID, N_OUT), lambda i: (0, 0)),  # w2 resident
            pl.BlockSpec((1, N_OUT), lambda i: (0, 0)),      # b2 resident
        ],
        out_specs=pl.BlockSpec((TB, N_OUT), lambda i: (i, 0)),
        compiler_params=pltpu.CompilerParams(
            dimension_semantics=("parallel",),
            vmem_limit_bytes=32 * 1024 * 1024,
        ),
        cost_estimate=cost,
    )(x, w1, b1, w2, b2)

    return out


def init_params(key):
    # Deterministic init mirroring nn.Linear's U(-1/sqrt(fan_in), 1/sqrt(fan_in))
    k1, k2, k3, k4 = jax.random.split(key, 4)
    bound1 = 1.0 / (784.0 ** 0.5)
    bound2 = 1.0 / (64.0 ** 0.5)
    w1 = jax.random.uniform(k1, (784, 64), jnp.float32, -bound1, bound1)
    b1 = jax.random.uniform(k2, (1, 64), jnp.float32, -bound1, bound1)
    w2 = jax.random.uniform(k3, (64, 10), jnp.float32, -bound2, bound2)
    b2 = jax.random.uniform(k4, (1, 10), jnp.float32, -bound2, bound2)
    return w1, b1, w2, b2


if __name__ == "__main__":
    key = jax.random.PRNGKey(0)
    kx, kp = jax.random.split(key)

    B = 8
    x = jax.random.normal(kx, (B, 784), dtype=jnp.float32)
    w1, b1, w2, b2 = init_params(kp)

    out = mlp_forward(x, w1, b1, w2, b2)
    jax.block_until_ready(out)

    # Sanity check against pure-JAX f32 reference.
    ref = jnp.maximum(x @ w1 + b1, 0.0) @ w2 + b2
    assert out.shape == (B, 10)
    assert jnp.allclose(out, ref, atol=1e-3, rtol=1e-3), (
        float(jnp.max(jnp.abs(out - ref))))

    print("KERNEL_OK")
</pallas_src>

<mosaic_0001>
module attributes {stable_mosaic.version = 11 : i64} {
  func.func @mlp_kernel(%arg0: i32, %arg1: memref<8x784xf32, #tpu.memory_space<vmem>>, %arg2: memref<784x64xf32, #tpu.memory_space<vmem>>, %arg3: memref<1x64xf32, #tpu.memory_space<vmem>>, %arg4: memref<64x10xf32, #tpu.memory_space<vmem>>, %arg5: memref<1x10xf32, #tpu.memory_space<vmem>>, %arg6: memref<8x10xf32, #tpu.memory_space<vmem>>) attributes {dimension_semantics = [#tpu.dimension_semantics<parallel>], iteration_bounds = array<i64: 1>, scalar_prefetch = 0 : i64, scratch_operands = 0 : i64, tpu.core_type = #tpu.core_type<tc>, window_params = [{transform_indices = @transform_0, window_bounds = array<i64: 8, 784>}, {pipeline_mode = #tpu.pipeline_mode<synchronous>, transform_indices = @transform_1, window_bounds = array<i64: 784, 64>}, {pipeline_mode = #tpu.pipeline_mode<synchronous>, transform_indices = @transform_2, window_bounds = array<i64: 1, 64>}, {pipeline_mode = #tpu.pipeline_mode<synchronous>, transform_indices = @transform_3, window_bounds = array<i64: 64, 10>}, {pipeline_mode = #tpu.pipeline_mode<synchronous>, transform_indices = @transform_4, window_bounds = array<i64: 1, 10>}, {transform_indices = @transform_5, window_bounds = array<i64: 8, 10>}]} {
    %c0 = arith.constant 0 : index
    %c0_0 = arith.constant 0 : index
    %0 = vector.load %arg1[%c0, %c0_0] : memref<8x784xf32, #tpu.memory_space<vmem>>, vector<8x784xf32>
    %c0_1 = arith.constant 0 : index
    %c0_2 = arith.constant 0 : index
    %1 = vector.load %arg2[%c0_1, %c0_2] : memref<784x64xf32, #tpu.memory_space<vmem>>, vector<784x64xf32>
    %cst = arith.constant dense<0.000000e+00> : vector<8x64xf32>
    %2 = tpu.matmul %0, %1, %cst {dimension_numbers = #tpu.dot_dimension_numbers<[1], [0], [0], [1], [0, 0, 1, 1], [], []>} : vector<8x784xf32>, vector<784x64xf32>, vector<8x64xf32> -> vector<8x64xf32>
    %c0_3 = arith.constant 0 : index
    %c0_4 = arith.constant 0 : index
    %3 = vector.load %arg3[%c0_3, %c0_4] : memref<1x64xf32, #tpu.memory_space<vmem>>, vector<1x64xf32>
    %4 = vector.broadcast %3 : vector<1x64xf32> to vector<8x64xf32>
    %5 = arith.addf %2, %4 : vector<8x64xf32>
    %cst_5 = arith.constant 0.000000e+00 : f32
    %6 = vector.broadcast %cst_5 : f32 to vector<8x64xf32>
    %7 = arith.maximumf %5, %6 : vector<8x64xf32>
    %c0_6 = arith.constant 0 : index
    %c0_7 = arith.constant 0 : index
    %8 = vector.load %arg4[%c0_6, %c0_7] : memref<64x10xf32, #tpu.memory_space<vmem>>, vector<64x10xf32>
    %cst_8 = arith.constant dense<0.000000e+00> : vector<8x10xf32>
    %9 = tpu.matmul %7, %8, %cst_8 {dimension_numbers = #tpu.dot_dimension_numbers<[1], [0], [0], [1], [0, 0, 1, 1], [], []>} : vector<8x64xf32>, vector<64x10xf32>, vector<8x10xf32> -> vector<8x10xf32>
    %c0_9 = arith.constant 0 : index
    %c0_10 = arith.constant 0 : index
    %10 = vector.load %arg5[%c0_9, %c0_10] : memref<1x10xf32, #tpu.memory_space<vmem>>, vector<1x10xf32>
    %11 = vector.broadcast %10 : vector<1x10xf32> to vector<8x10xf32>
    %12 = arith.addf %9, %11 : vector<8x10xf32>
    %c0_11 = arith.constant 0 : index
    %c0_12 = arith.constant 0 : index
    %13 = vector.load %arg6[%c0_11, %c0_12] : memref<8x10xf32, #tpu.memory_space<vmem>>, vector<8x10xf32>
    tpu.vector_store %arg6[%c0_11, %c0_12], %12 {strides = array<i32>} : memref<8x10xf32, #tpu.memory_space<vmem>>, vector<8x10xf32>,
    return
  }
  func.func @transform_0(%arg0: i32) -> (i32, i32) {
    %c0_i32 = arith.constant 0 : i32
    %c0_i32_0 = arith.constant 0 : i32
    return %arg0, %c0_i32 : i32, i32
  }
  func.func @transform_1(%arg0: i32) -> (i32, i32) {
    %c0_i32 = arith.constant 0 : i32
    %c0_i32_0 = arith.constant 0 : i32
    %c0_i32_1 = arith.constant 0 : i32
    return %c0_i32, %c0_i32_0 : i32, i32
  }
  func.func @transform_2(%arg0: i32) -> (i32, i32) {
    %c0_i32 = arith.constant 0 : i32
    %c0_i32_0 = arith.constant 0 : i32
    %c0_i32_1 = arith.constant 0 : i32
    return %c0_i32, %c0_i32_0 : i32, i32
  }
  func.func @transform_3(%arg0: i32) -> (i32, i32) {
    %c0_i32 = arith.constant 0 : i32
    %c0_i32_0 = arith.constant 0 : i32
    %c0_i32_1 = arith.constant 0 : i32
    return %c0_i32, %c0_i32_0 : i32, i32
  }
  func.func @transform_4(%arg0: i32) -> (i32, i32) {
    %c0_i32 = arith.constant 0 : i32
    %c0_i32_0 = arith.constant 0 : i32
    %c0_i32_1 = arith.constant 0 : i32
    return %c0_i32, %c0_i32_0 : i32, i32
  }
  func.func @transform_5(%arg0: i32) -> (i32, i32) {
    %c0_i32 = arith.constant 0 : i32
    %c0_i32_0 = arith.constant 0 : i32
    return %arg0, %c0_i32 : i32, i32
  }
}

</mosaic_0001>

<bundles_post_ra>
// kernel: tpu_custom_call.1
= control target key start
LH: loop header
LB: loop body
LE: loop exit
PB: predicated region body
PF: predicated region fallthrough
CT: control target
= control target key end

     0   :  { %s1205_s0 = inlined_call_operand.vmem [shape: f32[8,784], index: 0, kind: input, shape index: {}]   ;;  %s1206_s1 = inlined_call_operand.vmem [shape: f32[784,64], index: 1, kind: input, shape index: {}]   ;;  %s1207_s2 = inlined_call_operand.vmem [shape: f32[1,64], index: 2, kind: input, shape index: {}]   ;;  %s1208_s3 = inlined_call_operand.vmem [shape: f32[64,10], index: 3, kind: input, shape index: {}]   ;;  %s1209_s4 = inlined_call_operand.vmem [shape: f32[1,10], index: 4, kind: input, shape index: {}]   ;;  %s1210_s5 = inlined_call_operand.hbm [shape: f32[8,10], index: 5, kind: output, shape index: {}]  }
   0x1   :  { %v44_v0 = vld [vmem:[%s1206_s1 + $0x80] sm:$0xff]  ;;  %v45_v1 = vld [vmem:[%s1206_s1 + $0x88] sm:$0xff]  ;;  %v46_v11 = vld [vmem:[%s1206_s1 + $0x90] sm:$0xff] }
   0x2   :  { %v28_v2 = vld [vmem:[%s1206_s1] sm:$0xff]  ;;  %v670_v3 = vpack.c.bf16 %v45_v1, %v44_v0  ;;  %v29_v4 = vld [vmem:[%s1206_s1 + $0x8] sm:$0xff]  ;;  %v47_v13 = vld [vmem:[%s1206_s1 + $0x98] sm:$0xff] }
   0x3   :  { %v76_v5 = vld [vmem:[%s1206_s1 + $0x180] sm:$0xff]  ;;  %v77_v6 = vld [vmem:[%s1206_s1 + $0x188] sm:$0xff]  ;;  %v672_v7 = vpack.c.bf16 %v29_v4, %v28_v2  ;;  %v30_v14 = vld [vmem:[%s1206_s1 + $0x10] sm:$0xff]  ;;  %v674_v16 = vpack.c.bf16 %v47_v13, %v46_v11 }
   0x4   :  { %v702_v8 = vpack.c.bf16 %v77_v6, %v76_v5  ;;  %v60_v9 = vld [vmem:[%s1206_s1 + $0x100] sm:$0xff]  ;;  %v61_v10 = vld [vmem:[%s1206_s1 + $0x108] sm:$0xff]  ;;  %671 = vmatprep.subr.bf16.mxu0 %v670_v3  ;;  %v31_v15 = vld [vmem:[%s1206_s1 + $0x18] sm:$0xff] }
   0x5   :  { %v704_v12 = vpack.c.bf16 %v61_v10, %v60_v9  ;;  %673 = vmatpush3.bf16.msra.mxu0 %v672_v7  ;;  %v676_v17 = vpack.c.bf16 %v31_v15, %v30_v14  ;;  %v78_v18 = vld [vmem:[%s1206_s1 + $0x190] sm:$0xff]  ;;  %v79_v19 = vld [vmem:[%s1206_s1 + $0x198] sm:$0xff]  ;;  %v48_v23 = vld [vmem:[%s1206_s1 + $0xa0] sm:$0xff] }
   0x6   :  { %703 = vmatprep.subr.bf16.mxu1 %v702_v8  ;;  %v62_v20 = vld [vmem:[%s1206_s1 + $0x110] sm:$0xff]  ;;  %v706_v21 = vpack.c.bf16 %v79_v19, %v78_v18  ;;  %v63_v22 = vld [vmem:[%s1206_s1 + $0x118] sm:$0xff]  ;;  %v49_v24 = vld [vmem:[%s1206_s1 + $0xa8] sm:$0xff]  ;;  %675 = vmatprep.subr.bf16.mxu0 %v674_v16 }
   0x7   :  { %705 = vmatpush3.bf16.msra.mxu1 %v704_v12  ;;  %v708_v25 = vpack.c.bf16 %v63_v22, %v62_v20  ;;  %v678_v26 = vpack.c.bf16 %v49_v24, %v48_v23  ;;  %v32_v27 = vld [vmem:[%s1206_s1 + $0x20] sm:$0xff]  ;;  %v33_v28 = vld [vmem:[%s1206_s1 + $0x28] sm:$0xff]  ;;  %v50_v35 = vld [vmem:[%s1206_s1 + $0xb0] sm:$0xff] }
   0x8   :  { %v80_v29 = vld [vmem:[%s1206_s1 + $0x1a0] sm:$0xff]  ;;  %707 = vmatprep.subr.bf16.mxu1 %v706_v21  ;;  %v81_v30 = vld [vmem:[%s1206_s1 + $0x1a8] sm:$0xff]  ;;  %v680_v33 = vpack.c.bf16 %v33_v28, %v32_v27  ;;  %v51_v36 = vld [vmem:[%s1206_s1 + $0xb8] sm:$0xff] }
   0x9   :  { %v64_v31 = vld [vmem:[%s1206_s1 + $0x120] sm:$0xff]  ;;  %v65_v32 = vld [vmem:[%s1206_s1 + $0x128] sm:$0xff]  ;;  %677 = vmatpush3.bf16.msra.mxu0 %v676_v17  ;;  %v710_v34 = vpack.c.bf16 %v81_v30, %v80_v29  ;;  %v34_v37 = vld [vmem:[%s1206_s1 + $0x30] sm:$0xff]  ;;  %v682_v39 = vpack.c.bf16 %v51_v36, %v50_v35 }
   0xa   :  { %679 = vmatprep.subr.bf16.mxu0 %v678_v26  ;;  %v712_v38 = vpack.c.bf16 %v65_v32, %v64_v31  ;;  %v35_v40 = vld [vmem:[%s1206_s1 + $0x38] sm:$0xff]  ;;  %v82_v41 = vld [vmem:[%s1206_s1 + $0x1b0] sm:$0xff]  ;;  %v52_v46 = vld [vmem:[%s1206_s1 + $0xc0] sm:$0xff] }
   0xb   :  { %709 = vmatpush3.bf16.msra.mxu1 %v708_v25  ;;  %v83_v42 = vld [vmem:[%s1206_s1 + $0x1b8] sm:$0xff]  ;;  %v66_v44 = vld [vmem:[%s1206_s1 + $0x130] sm:$0xff]  ;;  %v53_v47 = vld [vmem:[%s1206_s1 + $0xc8] sm:$0xff]  ;;  %v684_v48 = vpack.c.bf16 %v35_v40, %v34_v37 }
   0xc   :  { %711 = vmatprep.subr.bf16.mxu1 %v710_v34  ;;  %v714_v43 = vpack.c.bf16 %v83_v42, %v82_v41  ;;  %v67_v45 = vld [vmem:[%s1206_s1 + $0x138] sm:$0xff]  ;;  %v84_v49 = vld [vmem:[%s1206_s1 + $0x1c0] sm:$0xff]  ;;  %v85_v50 = vld [vmem:[%s1206_s1 + $0x1c8] sm:$0xff]  ;;  %v686_v52 = vpack.c.bf16 %v53_v47, %v52_v46 }
   0xd   :  { %681 = vmatpush3.bf16.msra.mxu0 %v680_v33  ;;  %v716_v51 = vpack.c.bf16 %v67_v45, %v66_v44  ;;  %v36_v53 = vld [vmem:[%s1206_s1 + $0x40] sm:$0xff]  ;;  %v37_v54 = vld [vmem:[%s1206_s1 + $0x48] sm:$0xff]  ;;  %v718_v56 = vpack.c.bf16 %v85_v50, %v84_v49  ;;  %v54_v58 = vld [vmem:[%s1206_s1 + $0xd0] sm:$0xff]  ;;  %v809_v50 = vmov 0.0|0.0  }
   0xe   :  { %683 = vmatprep.subr.bf16.mxu0 %v682_v39  ;;  %v68_v55 = vld [vmem:[%s1206_s1 + $0x140] sm:$0xff]  ;;  %v69_v57 = vld [vmem:[%s1206_s1 + $0x148] sm:$0xff]  ;;  %v55_v59 = vld [vmem:[%s1206_s1 + $0xd8] sm:$0xff]  ;;  %v688_v62 = vpack.c.bf16 %v37_v54, %v36_v53 }
   0xf   :  { %713 = vmatpush3.bf16.msra.mxu1 %v712_v38  ;;  %v86_v60 = vld [vmem:[%s1206_s1 + $0x1d0] sm:$0xff]  ;;  %v87_v61 = vld [vmem:[%s1206_s1 + $0x1d8] sm:$0xff]  ;;  %v720_v63 = vpack.c.bf16 %v69_v57, %v68_v55  ;;  %v690_v0 = vpack.c.bf16 %v55_v59, %v54_v58  ;;  %v56_v6 = vld [vmem:[%s1206_s1 + $0xe0] sm:$0xff] }
  0x10   :  { %715 = vmatprep.subr.bf16.mxu1 %v714_v43  ;;  %v38_v1 = vld [vmem:[%s1206_s1 + $0x50] sm:$0xff]  ;;  %v39_v2 = vld [vmem:[%s1206_s1 + $0x58] sm:$0xff]  ;;  %v722_v4 = vpack.c.bf16 %v87_v61, %v86_v60  ;;  %v57_v7 = vld [vmem:[%s1206_s1 + $0xe8] sm:$0xff] }
  0x11   :  { %685 = vmatpush3.bf16.msra.mxu0 %v684_v48  ;;  %v70_v3 = vld [vmem:[%s1206_s1 + $0x150] sm:$0xff]  ;;  %v71_v5 = vld [vmem:[%s1206_s1 + $0x158] sm:$0xff]  ;;  %v88_v8 = vld [vmem:[%s1206_s1 + $0x1e0] sm:$0xff]  ;;  %v692_v10 = vpack.c.bf16 %v39_v2, %v38_v1  ;;  %v694_v14 = vpack.c.bf16 %v57_v7, %v56_v6 }
  0x12   :  { %687 = vmatprep.subr.bf16.mxu0 %v686_v52  ;;  %v89_v9 = vld [vmem:[%s1206_s1 + $0x1e8] sm:$0xff]  ;;  %v40_v11 = vld [vmem:[%s1206_s1 + $0x60] sm:$0xff]  ;;  %v724_v13 = vpack.c.bf16 %v71_v5, %v70_v3  ;;  %v58_v19 = vld [vmem:[%s1206_s1 + $0xf0] sm:$0xff] }
  0x13   :  { %717 = vmatpush3.bf16.msra.mxu1 %v716_v51  ;;  %v22_v12 = vld [vmem:[%s1205_s0 + $0x8] sm:$0xff]  ;;  %v72_v16 = vld [vmem:[%s1206_s1 + $0x160] sm:$0xff]  ;;  %v726_v18 = vpack.c.bf16 %v89_v9, %v88_v8  ;;  %v59_v20 = vld [vmem:[%s1206_s1 + $0xf8] sm:$0xff] }
  0x14   :  { %719 = vmatprep.subr.bf16.mxu1 %v718_v56  ;;  %v41_v15 = vld [vmem:[%s1206_s1 + $0x68] sm:$0xff]  ;;  %201 = vmatprep.mubr.f32.mxu0 %v22_v12  ;;  %v24_v21 = vld [vmem:[%s1205_s0 + $0x18] sm:$0xff]  ;;  %v90_v22 = vld [vmem:[%s1206_s1 + $0x1f0] sm:$0xff]  ;;  %v698_v26 = vpack.c.bf16 %v59_v20, %v58_v19 }
  0x15   :  { %689 = vmatpush3.bf16.msra.mxu0 %v688_v62  ;;  %v73_v17 = vld [vmem:[%s1206_s1 + $0x168] sm:$0xff]  ;;  %v91_v23 = vld [vmem:[%s1206_s1 + $0x1f8] sm:$0xff]  ;;  %271 = vmatprep.mubr.f32.mxu1 %v24_v21  ;;  %v696_v24 = vpack.c.bf16 %v41_v15, %v40_v11  ;;  %v42_v27 = vld [vmem:[%s1206_s1 + $0x70] sm:$0xff] }
  0x16   :  { %691 = vmatprep.subr.bf16.mxu0 %v690_v0  ;;  %v728_v25 = vpack.c.bf16 %v73_v17, %v72_v16  ;;  %v43_v28 = vld [vmem:[%s1206_s1 + $0x78] sm:$0xff]  ;;  %v74_v29 = vld [vmem:[%s1206_s1 + $0x170] sm:$0xff]  ;;  %v730_v30 = vpack.c.bf16 %v91_v23, %v90_v22  ;;  %v108_v32 = vld [vmem:[%s1206_s1 + $0x280] sm:$0xff] }
  0x17   :  { %721 = vmatpush3.bf16.msra.mxu1 %v720_v63  ;;  %v75_v31 = vld [vmem:[%s1206_s1 + $0x178] sm:$0xff]  ;;  %v109_v33 = vld [vmem:[%s1206_s1 + $0x288] sm:$0xff]  ;;  %v700_v34 = vpack.c.bf16 %v43_v28, %v42_v27  ;;  %v92_v37 = vld [vmem:[%s1206_s1 + $0x200] sm:$0xff] }
  0x18   :  { %723 = vmatprep.subr.bf16.mxu1 %v722_v4  ;;  %v732_v35 = vpack.c.bf16 %v75_v31, %v74_v29  ;;  %v734_v36 = vpack.c.bf16 %v109_v33, %v108_v32  ;;  %v93_v38 = vld [vmem:[%s1206_s1 + $0x208] sm:$0xff]  ;;  %v110_v39 = vld [vmem:[%s1206_s1 + $0x290] sm:$0xff]  ;;  %v111_v40 = vld [vmem:[%s1206_s1 + $0x298] sm:$0xff] }
  0x19   :  { %693 = vmatpush3.bf16.msra.mxu0 %v692_v10  ;;  %v21_v41 = vld [vmem:[%s1205_s0] sm:$0xff]  ;;  %v736_v42 = vpack.c.bf16 %v93_v38, %v92_v37  ;;  %v23_v43 = vld [vmem:[%s1205_s0 + $0x10] sm:$0xff]  ;;  %v738_v45 = vpack.c.bf16 %v111_v40, %v110_v39  ;;  %v95_v46 = vld [vmem:[%s1206_s1 + $0x218] sm:$0xff] }
  0x1a   :  { %695 = vmatprep.subr.bf16.mxu0 %v694_v14  ;;  %v94_v44 = vld [vmem:[%s1206_s1 + $0x210] sm:$0xff]  ;;  %v112_v47 = vld [vmem:[%s1206_s1 + $0x2a0] sm:$0xff]  ;;  %v113_v48 = vld [vmem:[%s1206_s1 + $0x2a8] sm:$0xff] }
  0x1b   :  { %725 = vmatpush3.bf16.msra.mxu1 %v724_v13  ;;  %v26_v49 = vld [vmem:[%s1205_s0 + $0x28] sm:$0xff]  ;;  %v124_v51 = vld [vmem:[%s1206_s1 + $0x300] sm:$0xff] }
  0x1c   :  { %727 = vmatprep.subr.bf16.mxu1 %v726_v18  ;;  %v125_v52 = vld [vmem:[%s1206_s1 + $0x308] sm:$0xff] }
  0x1d   :  { %697 = vmatpush3.bf16.msra.mxu0 %v696_v24  ;;  %v767_v53 = vpack.c.bf16 %v125_v52, %v124_v51 }
  0x1e   :  { %699 = vmatprep.subr.bf16.mxu0 %v698_v26 }
  0x1f   :  { %729 = vmatpush3.bf16.msra.mxu1 %v728_v25 }
  0x20   :  { %731 = vmatprep.subr.bf16.mxu1 %v730_v30 }
  0x21   :  { %701 = vmatpush3.bf16.msra.mxu0 %v700_v34 }
  0x22   :  { %735 = vmatprep.subr.bf16.mxu0 %v734_v36 }
  0x23   :  { %733 = vmatpush3.bf16.msra.mxu1 %v732_v35 }
  0x24   :  { %766 = vmatprep.subr.bf16.mxu1 %v809_v50  ;;  %202 = vmatmul.mubr.f32.vlgmr.msra.gmra.mrb[0].mxu0 %v21_v41 }
  0x25   :  { %10 = vsyncpa [#allocation3], 0  ;;  %737 = vmatpush3.bf16.msra.mxu0 %v736_v42  ;;  %v740_v54 = vpack.c.bf16 %v95_v46, %v94_v44  ;;  %v742_v55 = vpack.c.bf16 %v113_v48, %v112_v47  ;;  %v96_v56 = vld [vmem:[%s1206_s1 + $0x220] sm:$0xff]  ;;  %v97_v57 = vld [vmem:[%s1206_s1 + $0x228] sm:$0xff]  ;;  %341 = vmatprep.mubr.f32.mxu0 %v26_v49  ;;  %vm810_vm0 = vmmov 0   ;;  %v811_v60 = vmov 0.0  }
  0x26   :  { %272 = vmatmul.mubr.f32.vlgmr.msra.gmra.mrb[0].mxu1 %v23_v43  ;;  %739 = vmatprep.subr.bf16.mxu0 %v738_v45  ;;  %v114_v58 = vld [vmem:[%s1206_s1 + $0x2b0] sm:$0xff]  ;;  %v115_v59 = vld [vmem:[%s1206_s1 + $0x2b8] sm:$0xff]  ;;  %vm133_vm1 = vcmask 130048   ;;  %v744_v62 = vpack.c.bf16 %v97_v57, %v96_v56  ;;  %v116_v2 = vld [vmem:[%s1206_s1 + $0x2c0] sm:$0xff]  ;;  %vm433_vm2 = vcmask 523264   ;;  %vm507_vm3 = vcmask 80896  }
  0x27   :  { %768 = vmatpush3.bf16.msra.mxu1 %v767_v53  ;;  %648 = vmatprep.mubr.msk.f32.mxu1 %vm810_vm0, %v811_v60  ;;  %v27_v61 = vld [vmem:[%s1205_s0 + $0x30] sm:$0xff]  ;;  %v746_v63 = vpack.c.bf16 %v115_v59, %v114_v58  ;;  %v99_v1 = vld [vmem:[%s1206_s1 + $0x238] sm:$0xff]  ;;  %v117_v3 = vld [vmem:[%s1206_s1 + $0x2c8] sm:$0xff] }
  0x28   :  { %769 = vmatprep.subr.bf16.mxu1 %v809_v50  ;;  %v98_v0 = vld [vmem:[%s1206_s1 + $0x230] sm:$0xff]  ;;  %v750_v5 = vpack.c.bf16 %v117_v3, %v116_v2  ;;  %v100_v6 = vld [vmem:[%s1206_s1 + $0x240] sm:$0xff]  ;;  %v101_v7 = vld [vmem:[%s1206_s1 + $0x248] sm:$0xff] }
  0x29   :  { %741 = vmatpush3.bf16.msra.mxu0 %v740_v54  ;;  %v748_v4 = vpack.c.bf16 %v99_v1, %v98_v0  ;;  %v118_v8 = vld [vmem:[%s1206_s1 + $0x2d0] sm:$0xff]  ;;  %v119_v9 = vld [vmem:[%s1206_s1 + $0x2d8] sm:$0xff]  ;;  %v752_v10 = vpack.c.bf16 %v101_v7, %v100_v6  ;;  %v120_v14 = vld [vmem:[%s1206_s1 + $0x2e0] sm:$0xff] }
  0x2a   :  { %743 = vmatprep.subr.bf16.mxu0 %v742_v55  ;;  %649 = vmatmul.mubr.msk.f32.vlgmr.msra.gmra.mrb[2].mxu1 %vm133_vm1, %v27_v61  ;;  %v754_v11 = vpack.c.bf16 %v119_v9, %v118_v8  ;;  %v102_v12 = vld [vmem:[%s1206_s1 + $0x250] sm:$0xff]  ;;  %v103_v13 = vld [vmem:[%s1206_s1 + $0x258] sm:$0xff]  ;;  %v121_v15 = vld [vmem:[%s1206_s1 + $0x2e8] sm:$0xff] }
  0x2b   :  { %667 = vmatprep.mubr.msk.f32.mxu1 %vm810_vm0, %v811_v60  ;;  %v756_v16 = vpack.c.bf16 %v103_v13, %v102_v12  ;;  %v758_v17 = vpack.c.bf16 %v121_v15, %v120_v14  ;;  %v104_v18 = vld [vmem:[%s1206_s1 + $0x260] sm:$0xff]  ;;  %v105_v19 = vld [vmem:[%s1206_s1 + $0x268] sm:$0xff]  ;;  %v122_v20 = vld [vmem:[%s1206_s1 + $0x2f0] sm:$0xff] }
  0x2c   :  { %v123_v21 = vld [vmem:[%s1206_s1 + $0x2f8] sm:$0xff]  ;;  %v760_v22 = vpack.c.bf16 %v105_v19, %v104_v18  ;;  %v106_v24 = vld [vmem:[%s1206_s1 + $0x270] sm:$0xff]  ;;  %v25_v27 = vld [vmem:[%s1205_s0 + $0x20] sm:$0xff] }
  0x2d   :  { %745 = vmatpush3.bf16.msra.mxu0 %v744_v62  ;;  %v762_v23 = vpack.c.bf16 %v123_v21, %v122_v20  ;;  %v107_v25 = vld [vmem:[%s1206_s1 + $0x278] sm:$0xff]  ;;  %v418_v28 = vld [vmem:[%s1208_s3] sm:$0xff]  ;;  %v419_v29 = vld [vmem:[%s1208_s3 + $0x8] sm:$0xff] }
  0x2e   :  { %747 = vmatprep.subr.bf16.mxu0 %v746_v63  ;;  %v764_v26 = vpack.c.bf16 %v107_v25, %v106_v24  ;;  %v420_v30 = vld [vmem:[%s1208_s3 + $0x10] sm:$0xff]  ;;  %v770_v31 = vpack.c.bf16 %v419_v29, %v418_v28  ;;  %v421_v32 = vld [vmem:[%s1208_s3 + $0x18] sm:$0xff]  ;;  %v422_v34 = vld [vmem:[%s1208_s3 + $0x20] sm:$0xff] }
  0x2f   :  { %v773_v33 = vpack.c.bf16 %v421_v32, %v420_v30  ;;  %v423_v35 = vld [vmem:[%s1208_s3 + $0x28] sm:$0xff]  ;;  %v424_v37 = vld [vmem:[%s1208_s3 + $0x30] sm:$0xff]  ;;  %v425_v38 = vld [vmem:[%s1208_s3 + $0x38] sm:$0xff] }
  0x30   :  { %771 = vmatpush3.bf16.msra.mxu1 %v770_v31  ;;  %v776_v36 = vpack.c.bf16 %v423_v35, %v422_v34  ;;  %v779_v39 = vpack.c.bf16 %v425_v38, %v424_v37  ;;  %v523_v41 = vld [vmem:[%s1207_s2] ss:$0 sm:$0xff]  ;;  %s812_s2 = smov [#allocation2]  }
  0x31   :  { %749 = vmatpush3.bf16.msra.mxu0 %v748_v4  ;;  %772 = vmatprep.subr.bf16.mxu1 %v809_v50  ;;  %v525_v57 = vld [vmem:[%s1209_s4] ss:$0 sm:$0xff]  ;;  %s515_s20 = sshll.u32 %s812_s2, 4  ;;  %s516_s20 = int_to_ptr.vmem [resolvable:$true] %s515_s20 }
  0x32   :  { %751 = vmatprep.subr.bf16.mxu0 %v750_v5  ;;  %s785_s21 = scalar_lea.vmem %s516_s20, 128  ;;  %p790_p1 = scmp.lt.s32.totalorder %s516_s20, %s516_s20 }
  0x33   :  { %p786_p0 = scmp.ne.s32.totalorder %s516_s20, %s785_s21  ;;  %p791_p2 = scmp.lt.s32.totalorder %s785_s21, %s785_s21 }
  0x34   :  { %774 = vmatpush3.bf16.msra.mxu1 %v773_v33 }
  0x35   :  { %753 = vmatpush3.bf16.msra.mxu0 %v752_v10  ;;  %775 = vmatprep.subr.bf16.mxu1 %v809_v50  ;;  %p792_p3 = por %p791_p2, %p790_p1 }
  0x36   :  { %755 = vmatprep.subr.bf16.mxu0 %v754_v11 }
  0x37   :  { %p793_p4 = pnand %p792_p3, %p786_p0 }
  0x38   :  { %777 = vmatpush3.bf16.msra.mxu1 %v776_v36 }
  0x39   :  { %757 = vmatpush3.bf16.msra.mxu0 %v756_v16  ;;  %778 = vmatprep.subr.bf16.mxu1 %v809_v50 }
  0x3a   :  { %759 = vmatprep.subr.bf16.mxu0 %v758_v17 }
  0x3c   :  { %780 = vmatpush3.bf16.msra.mxu1 %v779_v39 }
  0x3d   :  { %761 = vmatpush3.bf16.msra.mxu0 %v760_v22 }
  0x3e   :  { %763 = vmatprep.subr.bf16.mxu0 %v762_v23 }
  0x41   :  { %765 = vmatpush3.bf16.msra.mxu0 %v764_v26 }
  0x44   :  { %342 = vmatmul.mubr.f32.vlgmr.msra.gmra.mrb[2].mxu0 %v25_v27 }
  0xf7   :  { %v559_v40 = vpop.f32.mrb[0].mxu0 }
  0xf8   :  { %v560_v42 = vpop.f32.mrb[1].mxu0 }
  0xf9   :  { %v594_v43 = vpop.f32.mrb[0].mxu1  ;;  %v561_v44 = vadd.f32 %v560_v42, %v559_v40 }
  0xfa   :  { %v595_v45 = vpop.f32.mrb[1].mxu1 }
  0xfb   :  { %v596_v46 = vadd.f32 %v595_v45, %v594_v43  ;;  %v204_v47 = vadd.f32 %v561_v44, %v523_v41 }
  0xfd   :  { %v274_v48 = vadd.f32 %v596_v46, %v204_v47  ;;  %v413_v49 = vpop.f32.mrb[2].mxu1 }
  0xfe   :  { %v650_v50 = vpop.f32.mrb[3].mxu1 }
 0x117   :  { %v629_v51 = vpop.f32.mrb[2].mxu0 }
 0x118   :  { %v630_v52 = vpop.f32.mrb[3].mxu0 }
 0x119   :  { %v631_v53 = vadd.f32 %v630_v52, %v629_v51 }
 0x11b   :  { %v344_v54 = vadd.f32 %v631_v53, %v274_v48 }
 0x11d   :  { %v414_v55 = vadd.f32 %v413_v49, %v344_v54 }
 0x11f   :  { %v417_v56 = vmax.f32 %v414_v55, 0.0 }
 0x121   :  { %668 = vmatmul.mubr.msk.f32.vlgmr.msra.gmra.mrb[4].mxu1 %vm433_vm2, %v417_v56 }
 0x1f4   :  { %v503_v58 = vpop.f32.mrb[4].mxu1 }
 0x1f5   :  { %v504_v59 = vadd.f32 %v525_v57, %v503_v58  ;;  %v669_v60 = vpop.f32.mrb[5].mxu1 }
 0x1f7   :  { %508 = vst.msk [vmem:[#allocation2] sm:$0xff] %vm507_vm3, %v504_v59 }
 0x1f8   :  { %796 = shalt.err (!%p793_p4)
}
 0x1f9   :  { %s797_s24 = scalar_lea.hbm %s1210_s5, 128 }
 0x1fa   :  { %p798_p5 = scmp.ne.s32.totalorder %s1210_s5, %s797_s24  ;;  %p801_p6 = scmp.lt.u32.totalorder %s797_s24, %s1210_s5 }
 0x1fc   :  { %p803_p7 = pnand %p801_p6, %p798_p5 }
 0x1fe   :  { %806 = shalt.err (!%p803_p7)
}
 0x1ff   :  { %518 = dma.vmem_to_hbm [thread:$0]  %s516_s20, 128, %s1210_s5, [#allocation3]  }
 0x200   :  { %807 = dma.done.wait [#allocation3], 128  }
 0x201   :  { %808 = vsyncadd [#allocation3], 4294967168 }
 0x202   :  { %522 = vsyncpa [#allocation3], 1 }

</bundles_post_ra>
